<compile_context>
chip_gen: v5e
topology: v5e:2x2
jax: 0.10.0
libtpu: 0.0.40
codegen_flags: <defaults>
</compile_context>

<pallas_src>
import jax
import jax.numpy as jnp
import numpy as np
from jax.experimental import pallas as pl
from jax.experimental.pallas import tpu as pltpu


# ----------------------------------------------------------------------------
# Pallas kernel: 3 fused lane-dense matmuls + elementwise abs / relu / bias.
# ----------------------------------------------------------------------------
def shortcut_kernel(x_ref, msob_ref, bsob_ref, m35_ref, b35_ref,
                    me_ref, be_ref, o_ref):
    f32 = jnp.float32
    bf16 = jnp.bfloat16
    D = x_ref.shape[-1]                                     # R*H*Cin (static)

    x = x_ref[...]                                          # (tb, D) bf16

    # stage 1: both depthwise Sobel convs fused into one band matmul, then |.|
    g = jnp.abs(jnp.dot(x, msob_ref[...], preferred_element_type=f32)
                + bsob_ref[...])                            # (tb, 2D) f32

    # stage 2: conv(3,1)+BN+ReLU and conv(5,1)+BN+ReLU as one block-diag matmul
    y = jnp.maximum(
        jnp.dot(g.astype(bf16), m35_ref[...], preferred_element_type=f32)
        + b35_ref[...], 0.0)                                # (tb, 2D) f32

    # sum of the two branches: lane-aligned 128-wide halves
    s = (y[:, :D] + y[:, D:]).astype(bf16)                  # (tb, D) bf16

    # stage 3: 1x1 conv + BN + ReLU, bf16 writeback
    out = jnp.dot(s, me_ref[...], preferred_element_type=f32) + be_ref[...]
    o_ref[...] = jnp.maximum(out, 0.0).astype(o_ref.dtype)  # (tb, E) bf16


# ----------------------------------------------------------------------------
# Device query (generation-aware VMEM budget + TensorCore count), with a
# conservative fallback (64 MiB VMEM, 1 TC) if the query is unavailable.
# ----------------------------------------------------------------------------
def _device_info():
    vmem_cap = 64 * 1024 * 1024
    n_cores = 1
    try:
        info = pltpu.get_tpu_info()
        try:
            v = int(getattr(info, "vmem_capacity_bytes"))
            if v > 0:
                vmem_cap = v
        except Exception:
            pass
        for attr in ("num_cores", "tensorcore_count", "num_tensorcores",
                     "core_count"):
            try:
                c = int(getattr(info, attr))
                if c > 0:
                    n_cores = c
                    break
            except Exception:
                continue
    except Exception:
        pass
    return vmem_cap, n_cores


# ----------------------------------------------------------------------------
# Tile-size selection: biggest packed-row tile that fits the VMEM budget,
# divides Bp, prefers bf16-friendly multiples of 16, and (on 2-TC parts only)
# leaves >= 2 grid steps so both TensorCores get work.
# ----------------------------------------------------------------------------
def _pick_tb(Bp, d_in, d_out, n_cores, vmem_budget_bytes):
    # per packed row: double-buffered bf16 in/out blocks + live f32
    # intermediates (g, y, s, out) + their bf16 casts.
    per_row = (2 * 2 * (d_in + d_out)
               + 4 * (2 * d_in + 2 * d_in + d_in + d_out)
               + 2 * (2 * d_in + d_in))
    # resident fused weights/biases (double-buffered) come off the top.
    weight_bytes = (2 * 2 * (2 * d_in * d_in + 4 * d_in * d_in + d_in * d_out)
                    + 2 * 4 * (4 * d_in + d_out))
    budget = max(vmem_budget_bytes - weight_bytes, 8 * per_row)
    cap = max(8, budget // per_row)
    if n_cores >= 2 and Bp >= 16:
        cap = min(cap, Bp // 2)     # keep grid >= 2 only when 2 TCs exist (v7x)
    cap = min(cap, Bp)
    divisors = [d for d in range(1, Bp + 1) if Bp % d == 0]
    for mult in (16, 8, 1):         # prefer multiples of 16 (bf16 sublanes)
        cands = [d for d in divisors if d % mult == 0 and d <= cap]
        if cands:
            return max(cands)
    return Bp


# ----------------------------------------------------------------------------
# Wrapper
# ----------------------------------------------------------------------------
def shortcut_forward(x_nchw, mats, tb=None):
    N, Cin, H, W = x_nchw.shape
    R = mats['pack']
    Din = mats['m_sob'].shape[0]            # R * H * Cin
    Dout = mats['me'].shape[1]              # R * H * Cout
    Cout = Dout // (R * H)
    B = N * W
    assert B % R == 0, "batch*width must be divisible by the row-pack factor"
    Bp = B // R

    # rows = (n, w) pairs (R packed per lane row), cols = h*Cin + c
    xb = jnp.transpose(x_nchw, (0, 3, 2, 1)).reshape(Bp, Din).astype(jnp.bfloat16)

    vmem_cap, n_cores = _device_info()
    if tb is None:
        tb = _pick_tb(Bp, Din, Dout, n_cores, int(vmem_cap * 0.4))
    assert Bp % tb == 0
    grid = (Bp // tb,)
    vmem_limit = min(int(vmem_cap * 0.75), 96 * 1024 * 1024)

    const2 = lambda i: (0, 0)               # resident fused weights / biases

    out = pl.pallas_call(
        shortcut_kernel,
        out_shape=jax.ShapeDtypeStruct((Bp, Dout), jnp.bfloat16),
        grid=grid,
        in_specs=[
            pl.BlockSpec((tb, Din), lambda i: (i, 0)),      # activations (bf16)
            pl.BlockSpec((Din, 2 * Din), const2),           # [My | My2]   (bf16)
            pl.BlockSpec((1, 2 * Din), const2),             # [by | by2]   (f32)
            pl.BlockSpec((2 * Din, 2 * Din), const2),       # blkdiag(M3,M5)
            pl.BlockSpec((1, 2 * Din), const2),             # [b3 | b5]
            pl.BlockSpec((Din, Dout), const2),              # Mend (1x1+BN)
            pl.BlockSpec((1, Dout), const2),                # be
        ],
        out_specs=pl.BlockSpec((tb, Dout), lambda i: (i, 0)),
        compiler_params=pltpu.CompilerParams(
            dimension_semantics=("parallel",),
            vmem_limit_bytes=vmem_limit),
    )(xb, mats['m_sob'], mats['b_sob'], mats['m35'], mats['b35'],
      mats['me'], mats['be'])

    # bf16 output + bf16 layout change (halves HBM writeback of the wrapper).
    # If the consumer can accept NWHC, skip this transpose entirely.
    return jnp.transpose(out.reshape(N, W, H, Cout), (0, 3, 2, 1))


# ----------------------------------------------------------------------------
# Parameter generation (synthetic PyTorch-module parameters, BN folded).
# ----------------------------------------------------------------------------
def make_params(key, cin, cout, eps=1e-5):
    ks = jax.random.split(key, 16)

    def bn(k1, k2, k3, k4, c):
        gamma = jax.random.uniform(k1, (c,), minval=0.5, maxval=1.5)
        beta = jax.random.normal(k2, (c,)) * 0.1
        mean = jax.random.normal(k3, (c,)) * 0.1
        var = jax.random.uniform(k4, (c,), minval=0.5, maxval=1.5)
        scale = gamma / jnp.sqrt(var + eps)
        shift = beta - mean * scale
        return scale, shift

    # depthwise sobel conv biases (fixed-tap weights, Conv2d default bias=True)
    by = jax.random.normal(ks[0], (cin,)) * 0.1
    by2 = jax.random.normal(ks[1], (cin,)) * 0.1

    # conv_bn_relu3: Conv2d(cin, cin, (3,1)) weight (c_out, c_in, 3) + BN folded
    w3_t = jax.random.normal(ks[2], (cin, cin, 3)) * 0.3
    b3 = jax.random.normal(ks[3], (cin,)) * 0.1
    sc3, sh3 = bn(ks[4], ks[5], ks[6], ks[7], cin)
    w3 = jnp.transpose(w3_t, (2, 1, 0)) * sc3[None, None, :]   # (k, c_in, c_out)
    b3f = b3 * sc3 + sh3

    # conv_bn_relu5: Conv2d(cin, cin, (5,1)) + BN folded
    w5_t = jax.random.normal(ks[8], (cin, cin, 5)) * 0.3
    b5 = jax.random.normal(ks[9], (cin,)) * 0.1
    sc5, sh5 = bn(ks[10], ks[11], ks[12], ks[13], cin)
    w5 = jnp.transpose(w5_t, (2, 1, 0)) * sc5[None, None, :]
    b5f = b5 * sc5 + sh5

    # end: Conv2d(cin, cout, 1x1) + BN folded
    we_t = jax.random.normal(ks[14], (cout, cin)) * 0.3
    be = jax.random.normal(ks[15], (cout,)) * 0.1
    kk = jax.random.split(jax.random.fold_in(key, 7), 4)
    sce, she = bn(kk[0], kk[1], kk[2], kk[3], cout)
    we = jnp.transpose(we_t, (1, 0)) * sce[None, :]            # (c_in, c_out)
    bef = be * sce + she

    return {'by': by, 'by2': by2, 'w3': w3, 'b3': b3f,
            'w5': w5, 'b5': b5f, 'we': we, 'be': bef}


# ----------------------------------------------------------------------------
# Fold the H-sliding convolutions into fused, row-packed band/block matrices
# over the flattened (row, h, c) lane axis.  Built once on the host.
# ----------------------------------------------------------------------------
def build_matrices(p, H, pack=None):
    w3 = np.asarray(p['w3'], np.float32)       # (3, c_in, c_out)
    w5 = np.asarray(p['w5'], np.float32)       # (5, c_in, c_out)
    we = np.asarray(p['we'], np.float32)       # (c_in, c_out)
    cin, cout = we.shape
    D1, D2 = H * cin, H * cout

    if pack is None:
        pack = 1
        while (pack * D1) % 128 != 0 and pack < 8:
            pack *= 2                          # smallest R with R*D1 lane-dense
    R = pack

    def band_depthwise(taps):                  # out[h,c] = sum_k taps[k]*in[h+k-off,c]
        K = len(taps); off = K // 2
        M = np.zeros((D1, D1), np.float32)
        eye_c = np.eye(cin, dtype=np.float32)
        for h in range(H):
            for k in range(K):
                hi = h + k - off
                if 0 <= hi < H and taps[k] != 0.0:
                    M[hi * cin:(hi + 1) * cin, h * cin:(h + 1) * cin] += taps[k] * eye_c
        return M

    def band_full(w):                          # out[h,d] = sum_{k,c} in[h+k-off,c]*w[k,c,d]
        K = w.shape[0]; off = K // 2
        M = np.zeros((D1, D1), np.float32)
        for h in range(H):
            for k in range(K):
                hi = h + k - off
                if 0 <= hi < H:
                    M[hi * cin:(hi + 1) * cin, h * cin:(h + 1) * cin] += w[k]
        return M

    def block_diag_1x1(w):                     # out[h,o] = sum_c in[h,c]*w[c,o]
        M = np.zeros((D1, D2), np.float32)
        for h in range(H):
            M[h * cin:(h + 1) * cin, h * cout:(h + 1) * cout] = w
        return M

    my = band_depthwise([1.0, 0.0, -1.0])
    my2 = band_depthwise([1.0, 2.0, 0.0, -2.0, -1.0])
    m3 = band_full(w3)
    m5 = band_full(w5)
    me1 = block_diag_1x1(we)

    def bd(M):                                 # R copies on the diagonal (row packing)
        return np.kron(np.eye(R, dtype=np.float32), M)

    D, E = R * D1, R * D2
    m_sob = np.concatenate([bd(my), bd(my2)], axis=1)          # (D, 2D)
    m35 = np.zeros((2 * D, 2 * D), np.float32)                 # blkdiag(M3, M5)
    m35[:D, :D] = bd(m3)
    m35[D:, D:] = bd(m5)
    me = bd(me1)                                               # (D, E)

    tile1 = lambda v: np.tile(np.asarray(v, np.float32), H)    # (H*C,)
    tileR = lambda v: np.tile(tile1(v), R)[None, :]            # (1, R*H*C)
    b_sob = np.concatenate([tileR(p['by']), tileR(p['by2'])], axis=1)
    b35 = np.concatenate([tileR(p['b3']), tileR(p['b5'])], axis=1)
    be = tileR(p['be'])

    bf16, f32 = jnp.bfloat16, jnp.float32
    return {
        'pack': R,
        'm_sob': jnp.asarray(m_sob, bf16),   # +-1/+-2 taps: exact in bf16
        'b_sob': jnp.asarray(b_sob, f32),
        'm35': jnp.asarray(m35, bf16),
        'b35': jnp.asarray(b35, f32),
        'me': jnp.asarray(me, bf16),
        'be': jnp.asarray(be, f32),
    }


# ----------------------------------------------------------------------------
# Pure-JAX reference: shift-based formulation (independent of the band-matrix
# folding) with the same bf16 matmul-operand rounding as the kernel.
# ----------------------------------------------------------------------------
def _shift_h(x, s):
    """y[:, h, :] = x[:, h - s, :], zero padded outside [0, H)."""
    B, H, C = x.shape
    if s == 0:
        return x
    if s > 0:
        return jnp.concatenate(
            [jnp.zeros((B, s, C), x.dtype), x[:, :H - s, :]], axis=1)
    s = -s
    return jnp.concatenate(
        [x[:, s:, :], jnp.zeros((B, s, C), x.dtype)], axis=1)


def shortcut_reference(x_nchw, p):
    N, Cin, H, W = x_nchw.shape
    Cout = p['we'].shape[-1]
    bf16, f32 = jnp.bfloat16, jnp.float32

    x = jnp.transpose(x_nchw, (0, 3, 2, 1)).reshape(N * W, H, Cin)
    xb = x.astype(bf16).astype(f32)

    xy = jnp.abs(_shift_h(xb, 1) - _shift_h(xb, -1) + p['by'])
    xy2 = jnp.abs(_shift_h(xb, 2) + 2.0 * _shift_h(xb, 1)
                  - 2.0 * _shift_h(xb, -1) - _shift_h(xb, -2) + p['by2'])

    xyb, xy2b = xy.astype(bf16), xy2.astype(bf16)

    y3 = jnp.asarray(p['b3'], f32)
    for k in range(3):
        y3 = y3 + jnp.einsum('bhc,cd->bhd', _shift_h(xyb, 1 - k),
                             p['w3'][k].astype(bf16),
                             preferred_element_type=f32)
    y3 = jnp.maximum(y3, 0.0)

    y5 = jnp.asarray(p['b5'], f32)
    for k in range(5):
        y5 = y5 + jnp.einsum('bhc,cd->bhd', _shift_h(xy2b, 2 - k),
                             p['w5'][k].astype(bf16),
                             preferred_element_type=f32)
    y5 = jnp.maximum(y5, 0.0)

    s = (y3 + y5).astype(bf16)
    out = jnp.einsum('bhc,co->bho', s, p['we'].astype(bf16),
                     preferred_element_type=f32) + p['be']
    out = jnp.maximum(out, 0.0)
    return jnp.transpose(out.reshape(N, W, H, Cout), (0, 3, 2, 1))


if __name__ == "__main__":
    key = jax.random.PRNGKey(0)
    N, Cin, H, W = 2, 4, 16, 16
    Cout = 8

    kx, kp = jax.random.split(key)
    x = jax.random.normal(kx, (N, Cin, H, W), dtype=jnp.float32)   # NCHW, as in PyTorch
    params = make_params(kp, Cin, Cout)
    mats = build_matrices(params, H)

    out = shortcut_forward(x, mats)
    out = jax.block_until_ready(out)

    ref = shortcut_reference(x, params)
    assert out.shape == (N, Cout, H, W)
    out_f32 = np.asarray(jnp.asarray(out, dtype=jnp.float32))
    np.testing.assert_allclose(out_f32, np.asarray(ref), rtol=2e-2, atol=2e-2)
    print("KERNEL_OK")
</pallas_src>

<mosaic_0001>
module attributes {stable_mosaic.version = 11 : i64} {
  func.func @shortcut_kernel(%arg0: i32, %arg1: memref<16x128xbf16, #tpu.memory_space<vmem>>, %arg2: memref<128x256xbf16, #tpu.memory_space<vmem>>, %arg3: memref<1x256xf32, #tpu.memory_space<vmem>>, %arg4: memref<256x256xbf16, #tpu.memory_space<vmem>>, %arg5: memref<1x256xf32, #tpu.memory_space<vmem>>, %arg6: memref<128x256xbf16, #tpu.memory_space<vmem>>, %arg7: memref<1x256xf32, #tpu.memory_space<vmem>>, %arg8: memref<16x256xbf16, #tpu.memory_space<vmem>>) attributes {dimension_semantics = [#tpu.dimension_semantics<parallel>], iteration_bounds = array<i64: 1>, scalar_prefetch = 0 : i64, scratch_operands = 0 : i64, tpu.core_type = #tpu.core_type<tc>, window_params = [{transform_indices = @transform_0, window_bounds = array<i64: 16, 128>}, {pipeline_mode = #tpu.pipeline_mode<synchronous>, transform_indices = @transform_1, window_bounds = array<i64: 128, 256>}, {pipeline_mode = #tpu.pipeline_mode<synchronous>, transform_indices = @transform_2, window_bounds = array<i64: 1, 256>}, {pipeline_mode = #tpu.pipeline_mode<synchronous>, transform_indices = @transform_3, window_bounds = array<i64: 256, 256>}, {pipeline_mode = #tpu.pipeline_mode<synchronous>, transform_indices = @transform_4, window_bounds = array<i64: 1, 256>}, {pipeline_mode = #tpu.pipeline_mode<synchronous>, transform_indices = @transform_5, window_bounds = array<i64: 128, 256>}, {pipeline_mode = #tpu.pipeline_mode<synchronous>, transform_indices = @transform_6, window_bounds = array<i64: 1, 256>}, {transform_indices = @transform_7, window_bounds = array<i64: 16, 256>}]} {
    %c0 = arith.constant 0 : index
    %c0_0 = arith.constant 0 : index
    %0 = vector.load %arg1[%c0, %c0_0] : memref<16x128xbf16, #tpu.memory_space<vmem>>, vector<16x128xbf16>
    %c0_1 = arith.constant 0 : index
    %c0_2 = arith.constant 0 : index
    %1 = vector.load %arg2[%c0_1, %c0_2] : memref<128x256xbf16, #tpu.memory_space<vmem>>, vector<128x256xbf16>
    %cst = arith.constant dense<0.000000e+00> : vector<16x256xf32>
    %2 = tpu.matmul %0, %1, %cst {dimension_numbers = #tpu.dot_dimension_numbers<[1], [0], [0], [1], [0, 0, 1, 1], [], []>} : vector<16x128xbf16>, vector<128x256xbf16>, vector<16x256xf32> -> vector<16x256xf32>
    %c0_3 = arith.constant 0 : index
    %c0_4 = arith.constant 0 : index
    %3 = vector.load %arg3[%c0_3, %c0_4] : memref<1x256xf32, #tpu.memory_space<vmem>>, vector<1x256xf32>
    %4 = vector.broadcast %3 : vector<1x256xf32> to vector<16x256xf32>
    %5 = arith.addf %2, %4 : vector<16x256xf32>
    %6 = math.absf %5 : vector<16x256xf32>
    %7 = arith.truncf %6 : vector<16x256xf32> to vector<16x256xbf16>
    %c0_5 = arith.constant 0 : index
    %c0_6 = arith.constant 0 : index
    %8 = vector.load %arg4[%c0_5, %c0_6] : memref<256x256xbf16, #tpu.memory_space<vmem>>, vector<256x256xbf16>
    %cst_7 = arith.constant dense<0.000000e+00> : vector<16x256xf32>
    %9 = tpu.matmul %7, %8, %cst_7 {dimension_numbers = #tpu.dot_dimension_numbers<[1], [0], [0], [1], [0, 0, 1, 1], [], []>} : vector<16x256xbf16>, vector<256x256xbf16>, vector<16x256xf32> -> vector<16x256xf32>
    %c0_8 = arith.constant 0 : index
    %c0_9 = arith.constant 0 : index
    %10 = vector.load %arg5[%c0_8, %c0_9] : memref<1x256xf32, #tpu.memory_space<vmem>>, vector<1x256xf32>
    %11 = vector.broadcast %10 : vector<1x256xf32> to vector<16x256xf32>
    %12 = arith.addf %9, %11 : vector<16x256xf32>
    %cst_10 = arith.constant 0.000000e+00 : f32
    %13 = vector.broadcast %cst_10 : f32 to vector<16x256xf32>
    %14 = arith.maximumf %12, %13 : vector<16x256xf32>
    %15 = vector.extract_strided_slice %14 {offsets = [0, 0], sizes = [16, 128], strides = [1, 1]} : vector<16x256xf32> to vector<16x128xf32>
    %16 = vector.extract_strided_slice %14 {offsets = [0, 128], sizes = [16, 128], strides = [1, 1]} : vector<16x256xf32> to vector<16x128xf32>
    %17 = arith.addf %15, %16 : vector<16x128xf32>
    %18 = arith.truncf %17 : vector<16x128xf32> to vector<16x128xbf16>
    %c0_11 = arith.constant 0 : index
    %c0_12 = arith.constant 0 : index
    %19 = vector.load %arg6[%c0_11, %c0_12] : memref<128x256xbf16, #tpu.memory_space<vmem>>, vector<128x256xbf16>
    %cst_13 = arith.constant dense<0.000000e+00> : vector<16x256xf32>
    %20 = tpu.matmul %18, %19, %cst_13 {dimension_numbers = #tpu.dot_dimension_numbers<[1], [0], [0], [1], [0, 0, 1, 1], [], []>} : vector<16x128xbf16>, vector<128x256xbf16>, vector<16x256xf32> -> vector<16x256xf32>
    %c0_14 = arith.constant 0 : index
    %c0_15 = arith.constant 0 : index
    %21 = vector.load %arg7[%c0_14, %c0_15] : memref<1x256xf32, #tpu.memory_space<vmem>>, vector<1x256xf32>
    %22 = vector.broadcast %21 : vector<1x256xf32> to vector<16x256xf32>
    %23 = arith.addf %20, %22 : vector<16x256xf32>
    %cst_16 = arith.constant 0.000000e+00 : f32
    %24 = vector.broadcast %cst_16 : f32 to vector<16x256xf32>
    %25 = arith.maximumf %23, %24 : vector<16x256xf32>
    %26 = arith.truncf %25 : vector<16x256xf32> to vector<16x256xbf16>
    %c0_17 = arith.constant 0 : index
    %c0_18 = arith.constant 0 : index
    %27 = vector.load %arg8[%c0_17, %c0_18] : memref<16x256xbf16, #tpu.memory_space<vmem>>, vector<16x256xbf16>
    tpu.vector_store %arg8[%c0_17, %c0_18], %26 {strides = array<i32>} : memref<16x256xbf16, #tpu.memory_space<vmem>>, vector<16x256xbf16>,
    return
  }
  func.func @transform_0(%arg0: i32) -> (i32, i32) {
    %c0_i32 = arith.constant 0 : i32
    %c0_i32_0 = arith.constant 0 : i32
    return %arg0, %c0_i32 : i32, i32
  }
  func.func @transform_1(%arg0: i32) -> (i32, i32) {
    %c0_i32 = arith.constant 0 : i32
    %c0_i32_0 = arith.constant 0 : i32
    %c0_i32_1 = arith.constant 0 : i32
    return %c0_i32, %c0_i32_0 : i32, i32
  }
  func.func @transform_2(%arg0: i32) -> (i32, i32) {
    %c0_i32 = arith.constant 0 : i32
    %c0_i32_0 = arith.constant 0 : i32
    %c0_i32_1 = arith.constant 0 : i32
    return %c0_i32, %c0_i32_0 : i32, i32
  }
  func.func @transform_3(%arg0: i32) -> (i32, i32) {
    %c0_i32 = arith.constant 0 : i32
    %c0_i32_0 = arith.constant 0 : i32
    %c0_i32_1 = arith.constant 0 : i32
    return %c0_i32, %c0_i32_0 : i32, i32
  }
  func.func @transform_4(%arg0: i32) -> (i32, i32) {
    %c0_i32 = arith.constant 0 : i32
    %c0_i32_0 = arith.constant 0 : i32
    %c0_i32_1 = arith.constant 0 : i32
    return %c0_i32, %c0_i32_0 : i32, i32
  }
  func.func @transform_5(%arg0: i32) -> (i32, i32) {
    %c0_i32 = arith.constant 0 : i32
    %c0_i32_0 = arith.constant 0 : i32
    %c0_i32_1 = arith.constant 0 : i32
    return %c0_i32, %c0_i32_0 : i32, i32
  }
  func.func @transform_6(%arg0: i32) -> (i32, i32) {
    %c0_i32 = arith.constant 0 : i32
    %c0_i32_0 = arith.constant 0 : i32
    %c0_i32_1 = arith.constant 0 : i32
    return %c0_i32, %c0_i32_0 : i32, i32
  }
  func.func @transform_7(%arg0: i32) -> (i32, i32) {
    %c0_i32 = arith.constant 0 : i32
    %c0_i32_0 = arith.constant 0 : i32
    return %arg0, %c0_i32 : i32, i32
  }
}

</mosaic_0001>

<bundles_post_ra>
// kernel: tpu_custom_call.1
= control target key start
LH: loop header
LB: loop body
LE: loop exit
PB: predicated region body
PF: predicated region fallthrough
CT: control target
= control target key end

     0   :  { %12 = vsyncpa [#allocation3], 0  ;;  %s1240_s0 = inlined_call_operand.hbm [shape: bf16[16,128], index: 0, kind: input, shape index: {}]   ;;  %s1241_s1 = inlined_call_operand.hbm [shape: bf16[128,256], index: 1, kind: input, shape index: {}]   ;;  %s1242_s2 = inlined_call_operand.hbm [shape: f32[1,256], index: 2, kind: input, shape index: {}]   ;;  %s1243_s3 = inlined_call_operand.hbm [shape: bf16[256,256], index: 3, kind: input, shape index: {}]   ;;  %s1244_s4 = inlined_call_operand.vmem [shape: f32[1,256], index: 4, kind: input, shape index: {}]   ;;  %s1245_s5 = inlined_call_operand.hbm [shape: bf16[128,256], index: 5, kind: input, shape index: {}]   ;;  %s1246_s6 = inlined_call_operand.vmem [shape: f32[1,256], index: 6, kind: input, shape index: {}]   ;;  %s1247_s7 = inlined_call_operand.hbm [shape: bf16[16,256], index: 7, kind: output, shape index: {}]  }
   0x1   :  { %13 = vsyncpa [#allocation6], 0 }
   0x2   :  { %14 = vsyncpa [#allocation9], 0  ;;  %s33_s26 = sshll.u32 %s1241_s1, 4  ;;  %s34_s26 = int_to_ptr.hbm [resolvable:$true] %s33_s26 }
   0x3   :  { %15 = vsyncpa [#allocation4], 0  ;;  %s1154_s27 = smov [#allocation5]   ;;  %s57_s8 = sshll.u32 %s1243_s3, 4  ;;  %s58_s8 = int_to_ptr.hbm [resolvable:$true] %s57_s8 }
   0x4   :  { %s35_s28 = sshll.u32 %s1154_s27, 4  ;;  %s1155_s9 = smov 128   ;;  %s36_s28 = int_to_ptr.vmem [resolvable:$true] %s35_s28 }
   0x5   :  { %s1156_s10 = smov 8   ;;  %s1157_s11 = smov [#allocation8]  }
   0x6   :  { %41 = dma.hbm_to_vmem [thread:$0]  %s34_s26, 2048, %s36_s28, [#allocation6], %s1155_s9, %s1155_s9, %s1156_s10  }
   0x7   :  { %s59_s12 = sshll.u32 %s1157_s11, 4  ;;  %s20_s14 = sshll.u32 %s1240_s0, 4  ;;  %s60_s12 = int_to_ptr.vmem [resolvable:$true] %s59_s12  ;;  %s21_s14 = int_to_ptr.hbm [resolvable:$true] %s20_s14 }
   0x8   :  { %65 = dma.hbm_to_vmem [thread:$0]  %s58_s8, 4096, %s60_s12, [#allocation9], %s1155_s9, %s1155_s9, %s1156_s10  }
   0x9   :  { %s1158_s3 = smov [#allocation2]   ;;  %s47_s18 = sshll.u32 %s1242_s2, 4  ;;  %s48_s18 = int_to_ptr.hbm [resolvable:$true] %s47_s18 }
   0xa   :  { %s22_s15 = sshll.u32 %s1158_s3, 4  ;;  %s1159_s19 = smov 64   ;;  %s23_s15 = int_to_ptr.vmem [resolvable:$true] %s22_s15 }
   0xb   :  { %s1160_s20 = smov 4   ;;  %s1161_s21 = smov [#allocation7]  }
   0xc   :  { %28 = dma.hbm_to_vmem [thread:$0]  %s21_s14, 128, %s23_s15, [#allocation3], %s1159_s19, %s1159_s19, %s1160_s20  }
   0xd   :  { %s49_s22 = sshll.u32 %s1161_s21, 4  ;;  %s72_s24 = sshll.u32 %s1245_s5, 4  ;;  %s50_s22 = int_to_ptr.vmem [resolvable:$true] %s49_s22  ;;  %s73_s24 = int_to_ptr.hbm [resolvable:$true] %s72_s24 }
   0xe   :  { %52 = dma.hbm_to_vmem [thread:$0]  %s48_s18, 32, %s50_s22, [#allocation6]  }
   0xf   :  { %s1162_s25 = smov [#allocation10]  }
  0x10   :  { %s74_s26 = sshll.u32 %s1162_s25, 4  ;;  %s75_s26 = int_to_ptr.vmem [resolvable:$true] %s74_s26 }
  0x11   :  { %80 = dma.hbm_to_vmem [thread:$0]  %s73_s24, 2048, %s75_s26, [#allocation9], %s1155_s9, %s1155_s9, %s1156_s10  }
  0x12   :  { %1146 = dma.done.wait [#allocation3], 128  }
  0x13   :  { %1147 = vsyncadd [#allocation3], 4294967168 }
  0x14   :  { %1148 = dma.done.wait [#allocation6], 2080  }
  0x15   :  { %1149 = vsyncadd [#allocation6], 4294965216 }
  0x16   :  { %1150 = dma.done.wait [#allocation9], 6144  }
  0x17   :  { %1151 = vsyncadd [#allocation9], 4294961152  ;;  %v729_v0 = vld [vmem:[#allocation5 + $0x70] sm:$0xf]  ;;  %v943_v1 = vld [vmem:[#allocation5 + $0x74] sm:$0xf0] }
  0x18   :  { %v942_v2 = vld [vmem:[#allocation5 + $0x74] sm:$0xf]  ;;  %v730_v3 = vor.u32 %v943_v1, %v729_v0  ;;  %v731_v4 = vld [vmem:[#allocation5 + $0x78] sm:$0xf0]  ;;  %v721_v5 = vld [vmem:[#allocation5 + $0x60] sm:$0xf] }
  0x19   :  { %v941_v6 = vld [vmem:[#allocation5 + $0x64] sm:$0xf0]  ;;  %v734_v7 = vor.u32 %v942_v2, %v731_v4  ;;  %v940_v8 = vld [vmem:[#allocation5 + $0x64] sm:$0xf]  ;;  %v723_v9 = vld [vmem:[#allocation5 + $0x68] sm:$0xf0] }
  0x1a   :  { %213 = vmatpush.bf16.msra.mxu0 %v730_v3  ;;  %v722_v10 = vor.u32 %v941_v6, %v721_v5  ;;  %v726_v11 = vor.u32 %v940_v8, %v723_v9  ;;  %v713_v12 = vld [vmem:[#allocation5 + $0x50] sm:$0xf]  ;;  %v939_v13 = vld [vmem:[#allocation5 + $0x54] sm:$0xf0]  ;;  %v938_v14 = vld [vmem:[#allocation5 + $0x54] sm:$0xf] }
  0x1b   :  { %227 = vmatpush.bf16.msra.mxu1 %v734_v7  ;;  %v715_v15 = vld [vmem:[#allocation5 + $0x58] sm:$0xf0]  ;;  %v714_v16 = vor.u32 %v939_v13, %v713_v12  ;;  %v705_v18 = vld [vmem:[#allocation5 + $0x40] sm:$0xf]  ;;  %v937_v19 = vld [vmem:[#allocation5 + $0x44] sm:$0xf0] }
  0x1c   :  { %v718_v17 = vor.u32 %v938_v14, %v715_v15  ;;  %v936_v20 = vld [vmem:[#allocation5 + $0x44] sm:$0xf]  ;;  %v707_v21 = vld [vmem:[#allocation5 + $0x48] sm:$0xf0]  ;;  %v706_v22 = vor.u32 %v937_v19, %v705_v18  ;;  %v793_v23 = vld [vmem:[#allocation8 + $0x70] sm:$0xf] }
  0x1d   :  { %v959_v24 = vld [vmem:[#allocation8 + $0x74] sm:$0xf0]  ;;  %v857_v25 = vld [vmem:[#allocation8 + $0xf0] sm:$0xf]  ;;  %v710_v26 = vor.u32 %v936_v20, %v707_v21  ;;  %v785_v34 = vld [vmem:[#allocation8 + $0x60] sm:$0xf] }
  0x1e   :  { %214 = vmatpush.bf16.msra.mxu0 %v722_v10  ;;  %v697_v27 = vld [vmem:[#allocation5 + $0x30] sm:$0xf]  ;;  %v935_v28 = vld [vmem:[#allocation5 + $0x34] sm:$0xf0]  ;;  %v794_v29 = vor.u32 %v959_v24, %v793_v23  ;;  %v934_v31 = vld [vmem:[#allocation5 + $0x34] sm:$0xf] }
  0x1f   :  { %228 = vmatpush.bf16.msra.mxu1 %v726_v11  ;;  %v975_v30 = vld [vmem:[#allocation8 + $0xf4] sm:$0xf0]  ;;  %v957_v35 = vld [vmem:[#allocation8 + $0x64] sm:$0xf0]  ;;  %v849_v36 = vld [vmem:[#allocation8 + $0xe0] sm:$0xf]  ;;  %v698_v38 = vor.u32 %v935_v28, %v697_v27 }
  0x20   :  { %v699_v32 = vld [vmem:[#allocation5 + $0x38] sm:$0xf0]  ;;  %v858_v33 = vor.u32 %v975_v30, %v857_v25  ;;  %445 = vmatpush.bf16.msra.mxu2 %v794_v29  ;;  %v973_v37 = vld [vmem:[#allocation8 + $0xe4] sm:$0xf0]  ;;  %v689_v39 = vld [vmem:[#allocation5 + $0x20] sm:$0xf]  ;;  %v786_v41 = vor.u32 %v957_v35, %v785_v34 }
  0x21   :  { %v933_v40 = vld [vmem:[#allocation5 + $0x24] sm:$0xf0]  ;;  %v850_v42 = vor.u32 %v973_v37, %v849_v36  ;;  %v702_v43 = vor.u32 %v934_v31, %v699_v32  ;;  %v932_v44 = vld [vmem:[#allocation5 + $0x24] sm:$0xf]  ;;  %v777_v45 = vld [vmem:[#allocation8 + $0x50] sm:$0xf] }
  0x22   :  { %215 = vmatpush.bf16.msra.mxu0 %v714_v16  ;;  %459 = vmatpush.bf16.msra.mxu3 %v858_v33  ;;  %v955_v46 = vld [vmem:[#allocation8 + $0x54] sm:$0xf0]  ;;  %v691_v47 = vld [vmem:[#allocation5 + $0x28] sm:$0xf0]  ;;  %v841_v48 = vld [vmem:[#allocation8 + $0xd0] sm:$0xf]  ;;  %v690_v51 = vor.u32 %v933_v40, %v689_v39 }
  0x23   :  { %229 = vmatpush.bf16.msra.mxu1 %v718_v17  ;;  %v971_v49 = vld [vmem:[#allocation8 + $0xd4] sm:$0xf0]  ;;  %v778_v50 = vor.u32 %v955_v46, %v777_v45  ;;  %v681_v52 = vld [vmem:[#allocation5 + $0x10] sm:$0xf]  ;;  %v769_v54 = vld [vmem:[#allocation8 + $0x40] sm:$0xf]  ;;  %v694_v56 = vor.u32 %v932_v44, %v691_v47 }
  0x24   :  { %446 = vmatpush.bf16.msra.mxu2 %v786_v41  ;;  %v842_v53 = vor.u32 %v971_v49, %v841_v48  ;;  %v953_v55 = vld [vmem:[#allocation8 + $0x44] sm:$0xf0]  ;;  %v931_v57 = vld [vmem:[#allocation5 + $0x14] sm:$0xf0]  ;;  %v833_v58 = vld [vmem:[#allocation8 + $0xc0] sm:$0xf] }
  0x25   :  { %v969_v59 = vld [vmem:[#allocation8 + $0xc4] sm:$0xf0]  ;;  %v930_v60 = vld [vmem:[#allocation5 + $0x14] sm:$0xf]  ;;  %v683_v61 = vld [vmem:[#allocation5 + $0x18] sm:$0xf0]  ;;  %v770_v62 = vor.u32 %v953_v55, %v769_v54  ;;  %v682_v63 = vor.u32 %v931_v57, %v681_v52 }
  0x26   :  { %216 = vmatpush.bf16.msra.mxu0 %v706_v22  ;;  %460 = vmatpush.bf16.msra.mxu3 %v850_v42  ;;  %v834_v0 = vor.u32 %v969_v59, %v833_v58  ;;  %v686_v1 = vor.u32 %v930_v60, %v683_v61  ;;  %v673_v2 = vld [vmem:[#allocation5] sm:$0xf]  ;;  %v929_v3 = vld [vmem:[#allocation5 + $0x4] sm:$0xf0]  ;;  %v928_v4 = vld [vmem:[#allocation5 + $0x4] sm:$0xf] }
  0x27   :  { %230 = vmatpush.bf16.msra.mxu1 %v710_v26  ;;  %v675_v5 = vld [vmem:[#allocation5 + $0x8] sm:$0xf0]  ;;  %v958_v6 = vld [vmem:[#allocation8 + $0x74] sm:$0xf]  ;;  %v795_v7 = vld [vmem:[#allocation8 + $0x78] sm:$0xf0]  ;;  %v674_v10 = vor.u32 %v929_v3, %v673_v2 }
  0x28   :  { %447 = vmatpush.bf16.msra.mxu2 %v778_v50  ;;  %v974_v8 = vld [vmem:[#allocation8 + $0xf4] sm:$0xf]  ;;  %v859_v9 = vld [vmem:[#allocation8 + $0xf8] sm:$0xf0]  ;;  %v678_v11 = vor.u32 %v928_v4, %v675_v5  ;;  %v798_v12 = vor.u32 %v958_v6, %v795_v7  ;;  %v956_v14 = vld [vmem:[#allocation8 + $0x64] sm:$0xf] }
  0x29   :  { %v862_v13 = vor.u32 %v974_v8, %v859_v9  ;;  %v787_v15 = vld [vmem:[#allocation8 + $0x68] sm:$0xf0]  ;;  %v927_v16 = vld [vmem:[#allocation2] sm:$0xff]  ;;  %v972_v17 = vld [vmem:[#allocation8 + $0xe4] sm:$0xf]  ;;  %s1163_s28 = smov [#allocation11]  }
  0x2a   :  { %217 = vmatpush.bf16.msra.mxu0 %v698_v38  ;;  %461 = vmatpush.bf16.msra.mxu3 %v842_v53  ;;  %v851_v18 = vld [vmem:[#allocation8 + $0xe8] sm:$0xf0]  ;;  %v790_v19 = vor.u32 %v956_v14, %v787_v15  ;;  %v954_v21 = vld [vmem:[#allocation8 + $0x54] sm:$0xf]  ;;  %v779_v22 = vld [vmem:[#allocation8 + $0x58] sm:$0xf0] }
  0x2b   :  { %231 = vmatpush.bf16.msra.mxu1 %v702_v43  ;;  %v854_v20 = vor.u32 %v972_v17, %v851_v18  ;;  %v970_v23 = vld [vmem:[#allocation8 + $0xd4] sm:$0xf]  ;;  %v843_v24 = vld [vmem:[#allocation8 + $0xd8] sm:$0xf0]  ;;  %v782_v25 = vor.u32 %v954_v21, %v779_v22  ;;  %v952_v27 = vld [vmem:[#allocation8 + $0x44] sm:$0xf] }
  0x2c   :  { %448 = vmatpush.bf16.msra.mxu2 %v770_v62  ;;  %v846_v26 = vor.u32 %v970_v23, %v843_v24  ;;  %v771_v28 = vld [vmem:[#allocation8 + $0x48] sm:$0xf0]  ;;  %v968_v29 = vld [vmem:[#allocation8 + $0xc4] sm:$0xf]  ;;  %v761_v33 = vld [vmem:[#allocation8 + $0x30] sm:$0xf] }
  0x2d   :  { %v835_v30 = vld [vmem:[#allocation8 + $0xc8] sm:$0xf0]  ;;  %v774_v31 = vor.u32 %v952_v27, %v771_v28  ;;  %v951_v34 = vld [vmem:[#allocation8 + $0x34] sm:$0xf0]  ;;  %v825_v35 = vld [vmem:[#allocation8 + $0xb0] sm:$0xf] }
  0x2e   :  { %218 = vmatpush.bf16.msra.mxu0 %v690_v51  ;;  %462 = vmatpush.bf16.msra.mxu3 %v834_v0  ;;  %v838_v32 = vor.u32 %v968_v29, %v835_v30  ;;  %v762_v36 = vor.u32 %v951_v34, %v761_v33  ;;  %v967_v37 = vld [vmem:[#allocation8 + $0xb4] sm:$0xf0]  ;;  %v950_v38 = vld [vmem:[#allocation8 + $0x34] sm:$0xf]  ;;  %v763_v39 = vld [vmem:[#allocation8 + $0x38] sm:$0xf0] }
  0x2f   :  { %232 = vmatpush.bf16.msra.mxu1 %v694_v56  ;;  %v826_v40 = vor.u32 %v967_v37, %v825_v35  ;;  %v766_v41 = vor.u32 %v950_v38, %v763_v39  ;;  %v966_v42 = vld [vmem:[#allocation8 + $0xb4] sm:$0xf]  ;;  %v827_v43 = vld [vmem:[#allocation8 + $0xb8] sm:$0xf0]  ;;  %v753_v45 = vld [vmem:[#allocation8 + $0x20] sm:$0xf] }
  0x30   :  { %449 = vmatpush.bf16.msra.mxu2 %v762_v36  ;;  %v830_v44 = vor.u32 %v966_v42, %v827_v43  ;;  %v949_v46 = vld [vmem:[#allocation8 + $0x24] sm:$0xf0]  ;;  %v817_v48 = vld [vmem:[#allocation8 + $0xa0] sm:$0xf]  ;;  %v948_v50 = vld [vmem:[#allocation8 + $0x24] sm:$0xf] }
  0x31   :  { %v754_v47 = vor.u32 %v949_v46, %v753_v45  ;;  %v965_v49 = vld [vmem:[#allocation8 + $0xa4] sm:$0xf0]  ;;  %v755_v52 = vld [vmem:[#allocation8 + $0x28] sm:$0xf0]  ;;  %v964_v53 = vld [vmem:[#allocation8 + $0xa4] sm:$0xf] }
  0x32   :  { %219 = vmatpush.bf16.msra.mxu0 %v682_v63  ;;  %463 = vmatpush.bf16.msra.mxu3 %v826_v40  ;;  %v818_v51 = vor.u32 %v965_v49, %v817_v48  ;;  %v819_v54 = vld [vmem:[#allocation8 + $0xa8] sm:$0xf0]  ;;  %v758_v55 = vor.u32 %v948_v50, %v755_v52  ;;  %v745_v57 = vld [vmem:[#allocation8 + $0x10] sm:$0xf]  ;;  %v947_v58 = vld [vmem:[#allocation8 + $0x14] sm:$0xf0] }
  0x33   :  { %233 = vmatpush.bf16.msra.mxu1 %v686_v1  ;;  %v822_v56 = vor.u32 %v964_v53, %v819_v54  ;;  %v809_v59 = vld [vmem:[#allocation8 + $0x90] sm:$0xf]  ;;  %v746_v60 = vor.u32 %v947_v58, %v745_v57  ;;  %v963_v61 = vld [vmem:[#allocation8 + $0x94] sm:$0xf0]  ;;  %v946_v62 = vld [vmem:[#allocation8 + $0x14] sm:$0xf] }
  0x34   :  { %450 = vmatpush.bf16.msra.mxu2 %v754_v47  ;;  %v747_v63 = vld [vmem:[#allocation8 + $0x18] sm:$0xf0]  ;;  %v810_v0 = vor.u32 %v963_v61, %v809_v59  ;;  %v962_v2 = vld [vmem:[#allocation8 + $0x94] sm:$0xf]  ;;  %v737_v5 = vld [vmem:[#allocation8] sm:$0xf] }
  0x35   :  { %v750_v1 = vor.u32 %v946_v62, %v747_v63  ;;  %v811_v3 = vld [vmem:[#allocation8 + $0x98] sm:$0xf0]  ;;  %v945_v6 = vld [vmem:[#allocation8 + $0x4] sm:$0xf0]  ;;  %v801_v7 = vld [vmem:[#allocation8 + $0x80] sm:$0xf] }
  0x36   :  { %220 = vmatpush.bf16.msra.mxu0 %v674_v10  ;;  %464 = vmatpush.bf16.msra.mxu3 %v818_v51  ;;  %v814_v4 = vor.u32 %v962_v2, %v811_v3  ;;  %v738_v8 = vor.u32 %v945_v6, %v737_v5  ;;  %v961_v9 = vld [vmem:[#allocation8 + $0x84] sm:$0xf0]  ;;  %v944_v10 = vld [vmem:[#allocation8 + $0x4] sm:$0xf]  ;;  %v803_v15 = vld [vmem:[#allocation8 + $0x88] sm:$0xf0] }
  0x37   :  { %234 = vmatpush.bf16.msra.mxu1 %v678_v11  ;;  %v739_v11 = vld [vmem:[#allocation8 + $0x8] sm:$0xf0]  ;;  %v960_v14 = vld [vmem:[#allocation8 + $0x84] sm:$0xf]  ;;  %v921_v17 = vld [vmem:[#allocation10 + $0x70] sm:$0xf] }
  0x38   :  { %451 = vmatpush.bf16.msra.mxu2 %v746_v60  ;;  %v991_v18 = vld [vmem:[#allocation10 + $0x74] sm:$0xf0]  ;;  %v923_v21 = vld [vmem:[#allocation10 + $0x78] sm:$0xf0]  ;;  %v913_v22 = vld [vmem:[#allocation10 + $0x60] sm:$0xf] }
  0x39   :  { %221 = vmatmul.bf16.vlgmr.msra.gmra.mxu0 %v927_v16  ;;  %v989_v23 = vld [vmem:[#allocation10 + $0x64] sm:$0xf0]  ;;  %v121_v29 = vld [vmem:[#allocation7] sm:$0x3]  ;;  %v905_v46 = vld [vmem:[#allocation10 + $0x50] sm:$0xf] }
  0x3a   :  { %473 = vmatpush.bf16.msrb.mxu0 %v798_v12  ;;  %235 = vmatmul.bf16.vlgmr.msra.gmra.mxu1 %v927_v16  ;;  %v802_v12 = vor.u32 %v961_v9, %v801_v7  ;;  %v806_v16 = vor.u32 %v960_v14, %v803_v15  ;;  %v914_v27 = vor.u32 %v989_v23, %v913_v22  ;;  %v124_v33 = vperm.slane %v121_v29, 1  ;;  %v987_v47 = vld [vmem:[#allocation10 + $0x54] sm:$0xf0]  ;;  %v986_v48 = vld [vmem:[#allocation10 + $0x54] sm:$0xf]  ;;  %s650_s29 = sshll.u32 %s1163_s28, 4  ;;  %s651_s29 = int_to_ptr.vmem [resolvable:$true] %s650_s29 }
  0x3b   :  { %487 = vmatpush.bf16.msrb.mxu1 %v862_v13  ;;  %465 = vmatpush.bf16.msra.mxu3 %v810_v0  ;;  %v742_v13 = vor.u32 %v944_v10, %v739_v11  ;;  %v906_v49 = vor.u32 %v987_v47, %v905_v46  ;;  %v907_v50 = vld [vmem:[#allocation10 + $0x58] sm:$0xf0]  ;;  %v897_v52 = vld [vmem:[#allocation10 + $0x40] sm:$0xf]  ;;  %v985_v53 = vld [vmem:[#allocation10 + $0x44] sm:$0xf0] }
  0x3c   :  { %452 = vmatpush.bf16.msra.mxu2 %v738_v8  ;;  %v910_v51 = vor.u32 %v986_v48, %v907_v50  ;;  %v984_v54 = vld [vmem:[#allocation10 + $0x44] sm:$0xf]  ;;  %v889_v58 = vld [vmem:[#allocation10 + $0x30] sm:$0xf]  ;;  %v983_v59 = vld [vmem:[#allocation10 + $0x34] sm:$0xf0] }
  0x3d   :  { %v982_v60 = vld [vmem:[#allocation10 + $0x34] sm:$0xf]  ;;  %v890_v61 = vor.u32 %v983_v59, %v889_v58  ;;  %v891_v62 = vld [vmem:[#allocation10 + $0x38] sm:$0xf0]  ;;  %v881_v0 = vld [vmem:[#allocation10 + $0x20] sm:$0xf] }
  0x3e   :  { %474 = vmatpush.bf16.msrb.mxu0 %v790_v19  ;;  %v990_v19 = vld [vmem:[#allocation10 + $0x74] sm:$0xf]  ;;  %v894_v63 = vor.u32 %v982_v60, %v891_v62  ;;  %v980_v2 = vld [vmem:[#allocation10 + $0x24] sm:$0xf]  ;;  %v873_v6 = vld [vmem:[#allocation10 + $0x10] sm:$0xf] }
  0x3f   :  { %488 = vmatpush.bf16.msrb.mxu1 %v854_v20  ;;  %466 = vmatpush.bf16.msra.mxu3 %v802_v12  ;;  %v922_v20 = vor.u32 %v991_v18, %v921_v17  ;;  %v926_v24 = vor.u32 %v990_v19, %v923_v21  ;;  %v979_v7 = vld [vmem:[#allocation10 + $0x14] sm:$0xf0]  ;;  %v978_v8 = vld [vmem:[#allocation10 + $0x14] sm:$0xf]  ;;  %v875_v10 = vld [vmem:[#allocation10 + $0x18] sm:$0xf0] }
  0x40   :  { %v874_v9 = vor.u32 %v979_v7, %v873_v6  ;;  %v878_v11 = vor.u32 %v978_v8, %v875_v10  ;;  %v865_v12 = vld [vmem:[#allocation10] sm:$0xf]  ;;  %v976_v14 = vld [vmem:[#allocation10 + $0x4] sm:$0xf]  ;;  %v279_v19 = vld [vmem:[%s1244_s4] sm:$0x3] }
  0x41   :  { %610 = vmatpush.bf16.msrb.mxu2 %v922_v20  ;;  %v281_v21 = vperm.slane %v279_v19, 0  ;;  %v282_v23 = vperm.slane %v279_v19, 1 }
  0x42   :  { %475 = vmatpush.bf16.msrb.mxu0 %v782_v25  ;;  %v988_v25 = vld [vmem:[#allocation10 + $0x64] sm:$0xf] }
  0x43   :  { %489 = vmatpush.bf16.msrb.mxu1 %v846_v26  ;;  %v915_v26 = vld [vmem:[#allocation10 + $0x68] sm:$0xf0]  ;;  %624 = vmatpush.bf16.msrb.mxu3 %v926_v24 }
  0x44   :  { %v918_v28 = vor.u32 %v988_v25, %v915_v26 }
  0x45   :  { %611 = vmatpush.bf16.msrb.mxu2 %v914_v27 }
  0x46   :  { %476 = vmatpush.bf16.msrb.mxu0 %v774_v31 }
  0x47   :  { %490 = vmatpush.bf16.msrb.mxu1 %v838_v32  ;;  %625 = vmatpush.bf16.msrb.mxu3 %v918_v28  ;;  %v123_v32 = vperm.slane %v121_v29, 0 }
  0x49   :  { %612 = vmatpush.bf16.msrb.mxu2 %v906_v49 }
  0x4a   :  { %477 = vmatpush.bf16.msrb.mxu0 %v766_v41 }
  0x4b   :  { %491 = vmatpush.bf16.msrb.mxu1 %v830_v44  ;;  %626 = vmatpush.bf16.msrb.mxu3 %v910_v51 }
  0x4e   :  { %478 = vmatpush.bf16.msrb.mxu0 %v758_v55  ;;  %v898_v55 = vor.u32 %v985_v53, %v897_v52 }
  0x4f   :  { %492 = vmatpush.bf16.msrb.mxu1 %v822_v56  ;;  %v899_v56 = vld [vmem:[#allocation10 + $0x48] sm:$0xf0] }
  0x50   :  { %v902_v57 = vor.u32 %v984_v54, %v899_v56  ;;  %613 = vmatpush.bf16.msrb.mxu2 %v898_v55 }
  0x52   :  { %479 = vmatpush.bf16.msrb.mxu0 %v750_v1  ;;  %627 = vmatpush.bf16.msrb.mxu3 %v902_v57  ;;  %v981_v1 = vld [vmem:[#allocation10 + $0x24] sm:$0xf0] }
  0x53   :  { %493 = vmatpush.bf16.msrb.mxu1 %v814_v4  ;;  %v882_v3 = vor.u32 %v981_v1, %v881_v0  ;;  %v883_v4 = vld [vmem:[#allocation10 + $0x28] sm:$0xf0] }
  0x54   :  { %614 = vmatpush.bf16.msrb.mxu2 %v890_v61  ;;  %v886_v5 = vor.u32 %v980_v2, %v883_v4 }
  0x56   :  { %480 = vmatpush.bf16.msrb.mxu0 %v742_v13  ;;  %628 = vmatpush.bf16.msrb.mxu3 %v894_v63  ;;  %v977_v13 = vld [vmem:[#allocation10 + $0x4] sm:$0xf0] }
  0x57   :  { %494 = vmatpush.bf16.msrb.mxu1 %v806_v16  ;;  %v866_v15 = vor.u32 %v977_v13, %v865_v12  ;;  %v867_v16 = vld [vmem:[#allocation10 + $0x8] sm:$0xf0] }
  0x58   :  { %615 = vmatpush.bf16.msrb.mxu2 %v882_v3  ;;  %v870_v17 = vor.u32 %v976_v14, %v867_v16 }
  0x5a   :  { %629 = vmatpush.bf16.msrb.mxu3 %v886_v5 }
  0x5c   :  { %616 = vmatpush.bf16.msrb.mxu2 %v874_v9 }
  0x5e   :  { %630 = vmatpush.bf16.msrb.mxu3 %v878_v11 }
  0x60   :  { %617 = vmatpush.bf16.msrb.mxu2 %v866_v15 }
  0x62   :  { %631 = vmatpush.bf16.msrb.mxu3 %v870_v17 }
  0xb6   :  { %v222_v30 = vpop.f32.mrf.mxu0 }
  0xb7   :  { %v236_v31 = vpop.f32.mrf.mxu1  ;;  %v223_v34 = vadd.f32 %v222_v30, %v123_v32 }
  0xb8   :  { %v237_v35 = vadd.f32 %v236_v31, %v124_v33 }
  0xb9   :  { %v241_v40 = vand.u32 2147483647, %v223_v34 }
  0xba   :  { %v242_v42 = vand.u32 2147483647, %v237_v35 }
  0xbe   :  { %v224_v36 = vpop.f32.mrf.mxu0 }
  0xbf   :  { %v225_v37 = vadd.f32 %v224_v36, %v123_v32  ;;  %v238_v38 = vpop.f32.mrf.mxu1 }
  0xc0   :  { %v239_v39 = vadd.f32 %v238_v38, %v124_v33 }
  0xc1   :  { %v243_v41 = vand.u32 2147483647, %v225_v37 }
  0xc2   :  { %v244_v43 = vand.u32 2147483647, %v239_v39 }
  0xc3   :  { %v245_v44 = vpack.c.bf16 %v243_v41, %v241_v40 }
  0xc4   :  { %v246_v45 = vpack.c.bf16 %v244_v43, %v242_v42 }
  0xc5   :  { %453 = vmatmul.bf16.vlgmr.msra.gmra.mxu2 %v245_v44  ;;  %481 = vmatmul.bf16.vlgmr.msrb.gmra.mxu0 %v245_v44  ;;  %v524_v44 = vld [vmem:[%s1246_s6] sm:$0x3]  ;;  %s652_s6 = sshll.u32 %s1247_s7, 4  ;;  %s653_s6 = int_to_ptr.hbm [resolvable:$true] %s652_s6 }
  0xc6   :  { %467 = vmatmul.bf16.vlgmr.msra.gmra.mxu3 %v246_v45  ;;  %495 = vmatmul.bf16.vlgmr.msrb.gmra.mxu1 %v246_v45  ;;  %v526_v45 = vperm.slane %v524_v44, 0  ;;  %v527_v46 = vperm.slane %v524_v44, 1 }
 0x142   :  { %v482_v18 = vpop.f32.mrf.mxu0 }
 0x143   :  { %v496_v20 = vpop.f32.mrf.mxu1  ;;  %v483_v27 = vadd.f32 %v482_v18, %v282_v23 }
 0x145   :  { %v497_v32 = vadd.f32 %v496_v20, %v483_v27 }
 0x147   :  { %v502_v38 = vmax.f32 %v497_v32, 0.0 }
 0x148   :  { %v454_v22 = vpop.f32.mrf.mxu2 }
 0x149   :  { %v468_v24 = vpop.f32.mrf.mxu3  ;;  %v455_v26 = vadd.f32 %v454_v22, %v281_v21 }
 0x14a   :  { %v484_v25 = vpop.f32.mrf.mxu0 }
 0x14b   :  { %v485_v28 = vadd.f32 %v484_v25, %v282_v23  ;;  %v469_v29 = vadd.f32 %v468_v24, %v455_v26  ;;  %v498_v30 = vpop.f32.mrf.mxu1 }
 0x14d   :  { %v499_v33 = vadd.f32 %v498_v30, %v485_v28  ;;  %v501_v36 = vmax.f32 %v469_v29, 0.0 }
 0x14f   :  { %v504_v39 = vmax.f32 %v499_v33, 0.0  ;;  %v505_v41 = vadd.f32 %v502_v38, %v501_v36 }
 0x150   :  { %v456_v31 = vpop.f32.mrf.mxu2 }
 0x151   :  { %v457_v34 = vadd.f32 %v456_v31, %v281_v21  ;;  %v470_v35 = vpop.f32.mrf.mxu3 }
 0x153   :  { %v471_v37 = vadd.f32 %v470_v35, %v457_v34 }
 0x155   :  { %v503_v40 = vmax.f32 %v471_v37, 0.0 }
 0x157   :  { %v506_v42 = vadd.f32 %v504_v39, %v503_v40 }
 0x159   :  { %v507_v43 = vpack.c.bf16 %v506_v42, %v505_v41 }
 0x15b   :  { %618 = vmatmul.bf16.vlgmr.msrb.gmra.mxu2 %v507_v43  ;;  %632 = vmatmul.bf16.vlgmr.msrb.gmra.mxu3 %v507_v43 }
 0x1de   :  { %v619_v47 = vpop.f32.mrf.mxu2  ;;  %v633_v48 = vpop.f32.mrf.mxu3 }
 0x1df   :  { %v620_v49 = vadd.f32 %v619_v47, %v526_v45  ;;  %v634_v50 = vadd.f32 %v633_v48, %v527_v46 }
 0x1e1   :  { %v638_v51 = vmax.f32 %v620_v49, 0.0  ;;  %v639_v52 = vmax.f32 %v634_v50, 0.0 }
 0x1e3   :  { %v642_v53 = vpack.c.bf16 %v639_v52, %v638_v51 }
 0x1e5   :  { %644 = vst [vmem:[#allocation11] sm:$0xff] %v642_v53 }
 0x1e6   :  { %v621_v54 = vpop.f32.mrf.mxu2  ;;  %v635_v55 = vpop.f32.mrf.mxu3 }
 0x1e7   :  { %v622_v56 = vadd.f32 %v621_v54, %v526_v45  ;;  %v636_v57 = vadd.f32 %v635_v55, %v527_v46 }
 0x1e9   :  { %v640_v58 = vmax.f32 %v622_v56, 0.0  ;;  %v641_v59 = vmax.f32 %v636_v57, 0.0 }
 0x1eb   :  { %v643_v60 = vpack.c.bf16 %v641_v59, %v640_v58 }
 0x1ed   :  { %645 = vst [vmem:[#allocation11 + $0x8] sm:$0xff] %v643_v60 }
 0x1ee   :  { %658 = dma.vmem_to_hbm [thread:$0]  %s651_s29, 256, %s653_s6, [#allocation4], %s1155_s9, %s1155_s9, %s1156_s10  }
 0x1ef   :  { %1152 = dma.done.wait [#allocation4], 256  }
 0x1f0   :  { %1153 = vsyncadd [#allocation4], 4294967040 }
 0x1f1   :  { %663 = vsyncpa [#allocation3], 1 }
 0x1f2   :  { %664 = vsyncpa [#allocation6], 1 }
 0x1f3   :  { %665 = vsyncpa [#allocation9], 1 }
 0x1f4   :  { %666 = vsyncpa [#allocation4], 1 }

</bundles_post_ra>
